<compile_context>
chip_gen: v5e
topology: v5e:2x2
jax: 0.10.0
libtpu: 0.0.40
codegen_flags: <defaults>
</compile_context>

<pallas_src>
import jax
import jax.numpy as jnp
from jax.experimental import pallas as pl
from jax.experimental.pallas import tpu as pltpu

UCF_PREDICTOR_FC = [32, 64, 48, 16]   # [in, hidden1, hidden2, num_classes]


def _mlp_softmax_kernel(x_ref,
                        w1_ref, b1_ref,
                        w2_ref, b2_ref,
                        w3_ref, b3_ref,
                        o_ref):
    """(Linear+foldedBN -> ReLU) x2 -> Linear -> segmented Softmax.

    Each "row" of the tile packs TWO batch rows side by side in the lane dim
    (weights are block-diagonal), so the softmax is a segmented reduce over the
    lower / upper lane halves.  Matmul inputs are bf16, accumulation and all
    elementwise math are f32.  Dropout = identity (eval mode).
    """
    x = x_ref[...].astype(jnp.bfloat16)                       # [T, 64] f32->bf16 in-kernel

    # Layer 1: Linear (BN folded in) + ReLU
    h = jnp.dot(x, w1_ref[...], preferred_element_type=jnp.float32) + b1_ref[...]
    h = jnp.maximum(h, 0.0)

    # Layer 2: Linear (BN folded in) + ReLU
    h = jnp.dot(h.astype(jnp.bfloat16), w2_ref[...],
                preferred_element_type=jnp.float32) + b2_ref[...]
    h = jnp.maximum(h, 0.0)

    # Final Linear
    logits = jnp.dot(h.astype(jnp.bfloat16), w3_ref[...],
                     preferred_element_type=jnp.float32) + b3_ref[...]   # [T, 2*C]

    # Numerically-stable softmax over each of the two packed lane groups.
    half = logits.shape[-1] // 2
    lane = jax.lax.broadcasted_iota(jnp.int32, logits.shape, 1)
    in_lo = lane < half
    neg_inf = jnp.float32(-jnp.inf)

    m_lo = jnp.max(jnp.where(in_lo, logits, neg_inf), axis=-1, keepdims=True)
    m_hi = jnp.max(jnp.where(in_lo, neg_inf, logits), axis=-1, keepdims=True)
    m = jnp.where(in_lo, m_lo, m_hi)
    e = jnp.exp(logits - m)
    s_lo = jnp.sum(jnp.where(in_lo, e, 0.0), axis=-1, keepdims=True)
    s_hi = jnp.sum(jnp.where(in_lo, 0.0, e), axis=-1, keepdims=True)
    denom = jnp.where(in_lo, s_lo, s_hi)
    o_ref[...] = e * pl.reciprocal(denom, approx=True)


def _blockdiag2(w):
    """[[w, 0], [0, w]] — lets one packed row carry two independent batch rows."""
    z = jnp.zeros_like(w)
    top = jnp.concatenate([w, z], axis=1)
    bot = jnp.concatenate([z, w], axis=1)
    return jnp.concatenate([top, bot], axis=0)


def ucf_image_predictor_forward(x, params, tile_pairs_max=4096):
    """x: [N, UCF_PREDICTOR_FC[0]] f32 -> class probs [N, UCF_PREDICTOR_FC[-1]] f32."""
    (w1, b1, s1, t1, w2, b2, s2, t2, w3, b3) = params

    # Fold eval-mode BatchNorm into the preceding Linear (host side, tiny),
    # then build the 2-row block-diagonal packed weights.
    w1f = (w1 * s1).astype(jnp.bfloat16)
    b1f = (b1 * s1 + t1).astype(jnp.float32)
    w2f = (w2 * s2).astype(jnp.bfloat16)
    b2f = (b2 * s2 + t2).astype(jnp.float32)
    w3f = w3.astype(jnp.bfloat16)
    b3f = b3.astype(jnp.float32)

    w1b = _blockdiag2(w1f); b1b = jnp.concatenate([b1f, b1f], axis=-1)   # [64,128], [1,128]
    w2b = _blockdiag2(w2f); b2b = jnp.concatenate([b2f, b2f], axis=-1)   # [128,96], [1,96]
    w3b = _blockdiag2(w3f); b3b = jnp.concatenate([b3f, b3f], axis=-1)   # [96,32],  [1,32]

    n, in_f = x.shape
    n_cls = w3.shape[1]

    # Pack 2 batch rows per packed row (row-major reshape is free).  Only an odd
    # batch needs a single extra zero row.
    xp = x
    if n % 2 == 1:
        xp = jnp.pad(xp, ((0, 1), (0, 0)))
    n_pairs = xp.shape[0] // 2
    xp = xp.reshape(n_pairs, 2 * in_f)

    # Tile the packed-batch axis: big tiles for pipelining, rounded to the
    # (8, _) sublane grain, and >=2 grid steps whenever possible so the
    # "parallel" axis shards across v7x's two TensorCores.  The last (partial)
    # block is handled by Pallas boundary masking — no host pad / slice.
    if n_pairs <= 8:
        tile_np = n_pairs
    else:
        tile_np = max(8, min(tile_pairs_max,
                             pl.cdiv(pl.cdiv(n_pairs, 2), 8) * 8))
    grid = (pl.cdiv(n_pairs, tile_np),)

    def const_spec(shape):
        # Parameters: same block every grid step -> stay resident in VMEM.
        return pl.BlockSpec(shape, lambda i: (0, 0))

    out = pl.pallas_call(
        _mlp_softmax_kernel,
        out_shape=jax.ShapeDtypeStruct((n_pairs, 2 * n_cls), jnp.float32),
        grid=grid,
        in_specs=[
            pl.BlockSpec((tile_np, 2 * in_f), lambda i: (i, 0)),   # streaming packed-x tile
            const_spec(w1b.shape), const_spec(b1b.shape),
            const_spec(w2b.shape), const_spec(b2b.shape),
            const_spec(w3b.shape), const_spec(b3b.shape),
        ],
        out_specs=pl.BlockSpec((tile_np, 2 * n_cls), lambda i: (i, 0)),
        compiler_params=pltpu.CompilerParams(
            dimension_semantics=("parallel",)),
    )(xp, w1b, b1b, w2b, b2b, w3b, b3b)

    out = out.reshape(2 * n_pairs, n_cls)   # free row-major un-packing
    if 2 * n_pairs != n:                    # only when the batch was odd
        out = out[:n]
    return out


def init_params(key, fc=UCF_PREDICTOR_FC):
    """Deterministic synthetic parameters (weights stored as [in, out])."""
    ks = jax.random.split(key, 16)
    ki = iter(range(16))

    def lin(kw, kb, fin, fout):
        w = jax.random.normal(kw, (fin, fout), jnp.float32) * 0.05
        b = jax.random.normal(kb, (1, fout), jnp.float32) * 0.01
        return w, b

    def bn_fold(kg, kb, km, kv, f):
        gamma = 1.0 + 0.1 * jax.random.normal(kg, (1, f), jnp.float32)
        beta = 0.1 * jax.random.normal(kb, (1, f), jnp.float32)
        running_mean = 0.1 * jax.random.normal(km, (1, f), jnp.float32)
        running_var = 1.0 + 0.1 * jax.random.uniform(kv, (1, f), jnp.float32)
        eps = 1e-5
        scale = gamma / jnp.sqrt(running_var + eps)   # y = scale*(x - mean) + beta
        shift = beta - running_mean * scale
        return scale, shift

    w1, b1 = lin(ks[next(ki)], ks[next(ki)], fc[0], fc[1])
    s1, t1 = bn_fold(ks[next(ki)], ks[next(ki)], ks[next(ki)], ks[next(ki)], fc[1])
    w2, b2 = lin(ks[next(ki)], ks[next(ki)], fc[1], fc[2])
    s2, t2 = bn_fold(ks[next(ki)], ks[next(ki)], ks[next(ki)], ks[next(ki)], fc[2])
    w3, b3 = lin(ks[next(ki)], ks[next(ki)], fc[2], fc[3])
    return (w1, b1, s1, t1, w2, b2, s2, t2, w3, b3)


def _reference_forward_f32(x, params):
    """Exact-f32 reference of the module (eval-mode BN as scale/shift)."""
    (w1, b1, s1, t1, w2, b2, s2, t2, w3, b3) = params
    h = jnp.maximum((x @ w1 + b1) * s1 + t1, 0.0)
    h = jnp.maximum((h @ w2 + b2) * s2 + t2, 0.0)
    logits = h @ w3 + b3
    return jax.nn.softmax(logits, axis=-1)


def _reference_forward_bf16(x, params):
    """Reference that mimics the kernel's bf16 matmul inputs / f32 accum."""
    (w1, b1, s1, t1, w2, b2, s2, t2, w3, b3) = params

    def bf(a):
        return a.astype(jnp.bfloat16).astype(jnp.float32)

    w1f, b1f = bf(w1 * s1), b1 * s1 + t1
    w2f, b2f = bf(w2 * s2), b2 * s2 + t2
    w3f = bf(w3)
    h = jnp.maximum(bf(x) @ w1f + b1f, 0.0)
    h = jnp.maximum(bf(h) @ w2f + b2f, 0.0)
    logits = bf(h) @ w3f + b3
    return jax.nn.softmax(logits, axis=-1)


if __name__ == "__main__":
    key = jax.random.PRNGKey(0)
    kx, kx2, kp = jax.random.split(key, 3)
    params = init_params(kp)

    fwd = jax.jit(ucf_image_predictor_forward)

    # Small even batch (single grid step, no padding anywhere).
    batch = 8
    x = jax.random.normal(kx, (batch, UCF_PREDICTOR_FC[0]), jnp.float32)
    out = jax.block_until_ready(fwd(x, params))

    assert out.shape == (batch, UCF_PREDICTOR_FC[-1])
    assert jnp.allclose(out, _reference_forward_bf16(x, params), atol=5e-3), \
        "mismatch vs bf16-mimicking reference"
    assert jnp.allclose(out, _reference_forward_f32(x, params), atol=3e-2), \
        "mismatch vs f32 reference"
    assert jnp.allclose(jnp.sum(out, axis=-1), 1.0, atol=5e-3), \
        "softmax not normalized"

    # Odd batch: exercises the 1-row pack pad, the multi-step grid and the
    # Pallas-masked partial boundary block.
    batch2 = 203
    x2 = jax.random.normal(kx2, (batch2, UCF_PREDICTOR_FC[0]), jnp.float32)
    out2 = jax.block_until_ready(fwd(x2, params))
    assert out2.shape == (batch2, UCF_PREDICTOR_FC[-1])
    assert jnp.allclose(out2, _reference_forward_bf16(x2, params), atol=5e-3), \
        "mismatch vs bf16-mimicking reference (odd batch)"
    assert jnp.allclose(jnp.sum(out2, axis=-1), 1.0, atol=5e-3), \
        "softmax not normalized (odd batch)"

    print("KERNEL_OK")
</pallas_src>

<mosaic_0001>
module attributes {stable_mosaic.version = 11 : i64} {
  func.func @_mlp_softmax_kernel(%arg0: i32, %arg1: memref<4x64xf32, #tpu.memory_space<vmem>>, %arg2: memref<64x128xbf16, #tpu.memory_space<vmem>>, %arg3: memref<1x128xf32, #tpu.memory_space<vmem>>, %arg4: memref<128x96xbf16, #tpu.memory_space<vmem>>, %arg5: memref<1x96xf32, #tpu.memory_space<vmem>>, %arg6: memref<96x32xbf16, #tpu.memory_space<vmem>>, %arg7: memref<1x32xf32, #tpu.memory_space<vmem>>, %arg8: memref<4x32xf32, #tpu.memory_space<vmem>>) attributes {dimension_semantics = [#tpu.dimension_semantics<parallel>], iteration_bounds = array<i64: 1>, scalar_prefetch = 0 : i64, scratch_operands = 0 : i64, tpu.core_type = #tpu.core_type<tc>, window_params = [{transform_indices = @transform_0, window_bounds = array<i64: 4, 64>}, {pipeline_mode = #tpu.pipeline_mode<synchronous>, transform_indices = @transform_1, window_bounds = array<i64: 64, 128>}, {pipeline_mode = #tpu.pipeline_mode<synchronous>, transform_indices = @transform_2, window_bounds = array<i64: 1, 128>}, {pipeline_mode = #tpu.pipeline_mode<synchronous>, transform_indices = @transform_3, window_bounds = array<i64: 128, 96>}, {pipeline_mode = #tpu.pipeline_mode<synchronous>, transform_indices = @transform_4, window_bounds = array<i64: 1, 96>}, {pipeline_mode = #tpu.pipeline_mode<synchronous>, transform_indices = @transform_5, window_bounds = array<i64: 96, 32>}, {pipeline_mode = #tpu.pipeline_mode<synchronous>, transform_indices = @transform_6, window_bounds = array<i64: 1, 32>}, {transform_indices = @transform_7, window_bounds = array<i64: 4, 32>}]} {
    %c0 = arith.constant 0 : index
    %c0_0 = arith.constant 0 : index
    %0 = vector.load %arg1[%c0, %c0_0] : memref<4x64xf32, #tpu.memory_space<vmem>>, vector<4x64xf32>
    %1 = arith.truncf %0 : vector<4x64xf32> to vector<4x64xbf16>
    %c0_1 = arith.constant 0 : index
    %c0_2 = arith.constant 0 : index
    %2 = vector.load %arg2[%c0_1, %c0_2] : memref<64x128xbf16, #tpu.memory_space<vmem>>, vector<64x128xbf16>
    %cst = arith.constant dense<0.000000e+00> : vector<4x128xf32>
    %3 = tpu.matmul %1, %2, %cst {dimension_numbers = #tpu.dot_dimension_numbers<[1], [0], [0], [1], [0, 0, 1, 1], [], []>} : vector<4x64xbf16>, vector<64x128xbf16>, vector<4x128xf32> -> vector<4x128xf32>
    %c0_3 = arith.constant 0 : index
    %c0_4 = arith.constant 0 : index
    %4 = vector.load %arg3[%c0_3, %c0_4] : memref<1x128xf32, #tpu.memory_space<vmem>>, vector<1x128xf32>
    %5 = vector.broadcast %4 : vector<1x128xf32> to vector<4x128xf32>
    %6 = arith.addf %3, %5 : vector<4x128xf32>
    %cst_5 = arith.constant 0.000000e+00 : f32
    %7 = vector.broadcast %cst_5 : f32 to vector<4x128xf32>
    %8 = arith.maximumf %6, %7 : vector<4x128xf32>
    %9 = arith.truncf %8 : vector<4x128xf32> to vector<4x128xbf16>
    %c0_6 = arith.constant 0 : index
    %c0_7 = arith.constant 0 : index
    %10 = vector.load %arg4[%c0_6, %c0_7] : memref<128x96xbf16, #tpu.memory_space<vmem>>, vector<128x96xbf16>
    %cst_8 = arith.constant dense<0.000000e+00> : vector<4x96xf32>
    %11 = tpu.matmul %9, %10, %cst_8 {dimension_numbers = #tpu.dot_dimension_numbers<[1], [0], [0], [1], [0, 0, 1, 1], [], []>} : vector<4x128xbf16>, vector<128x96xbf16>, vector<4x96xf32> -> vector<4x96xf32>
    %c0_9 = arith.constant 0 : index
    %c0_10 = arith.constant 0 : index
    %12 = vector.load %arg5[%c0_9, %c0_10] : memref<1x96xf32, #tpu.memory_space<vmem>>, vector<1x96xf32>
    %13 = vector.broadcast %12 : vector<1x96xf32> to vector<4x96xf32>
    %14 = arith.addf %11, %13 : vector<4x96xf32>
    %cst_11 = arith.constant 0.000000e+00 : f32
    %15 = vector.broadcast %cst_11 : f32 to vector<4x96xf32>
    %16 = arith.maximumf %14, %15 : vector<4x96xf32>
    %17 = arith.truncf %16 : vector<4x96xf32> to vector<4x96xbf16>
    %c0_12 = arith.constant 0 : index
    %c0_13 = arith.constant 0 : index
    %18 = vector.load %arg6[%c0_12, %c0_13] : memref<96x32xbf16, #tpu.memory_space<vmem>>, vector<96x32xbf16>
    %cst_14 = arith.constant dense<0.000000e+00> : vector<4x32xf32>
    %19 = tpu.matmul %17, %18, %cst_14 {dimension_numbers = #tpu.dot_dimension_numbers<[1], [0], [0], [1], [0, 0, 1, 1], [], []>} : vector<4x96xbf16>, vector<96x32xbf16>, vector<4x32xf32> -> vector<4x32xf32>
    %c0_15 = arith.constant 0 : index
    %c0_16 = arith.constant 0 : index
    %20 = vector.load %arg7[%c0_15, %c0_16] : memref<1x32xf32, #tpu.memory_space<vmem>>, vector<1x32xf32>
    %21 = vector.broadcast %20 : vector<1x32xf32> to vector<4x32xf32>
    %22 = arith.addf %19, %21 : vector<4x32xf32>
    %23 = tpu.iota {dimensions = array<i32: 1>} : vector<4x32xi32>
    %c16_i32 = arith.constant 16 : i32
    %24 = vector.broadcast %c16_i32 : i32 to vector<4x32xi32>
    %25 = arith.cmpi slt, %23, %24 : vector<4x32xi32>
    %cst_17 = arith.constant 0xFF800000 : f32
    %26 = vector.broadcast %cst_17 : f32 to vector<4x32xf32>
    %27 = arith.select %25, %22, %26 : vector<4x32xi1>, vector<4x32xf32>
    %cst_18 = arith.constant dense<0xFF800000> : vector<4xf32>
    %28 = vector.multi_reduction <maximumf>, %27, %cst_18 [1] : vector<4x32xf32> to vector<4xf32>
    %29 = vector.shape_cast %28 : vector<4xf32> to vector<4x1xf32>
    %cst_19 = arith.constant 0xFF800000 : f32
    %30 = vector.broadcast %cst_19 : f32 to vector<4x32xf32>
    %31 = arith.select %25, %30, %22 : vector<4x32xi1>, vector<4x32xf32>
    %cst_20 = arith.constant dense<0xFF800000> : vector<4xf32>
    %32 = vector.multi_reduction <maximumf>, %31, %cst_20 [1] : vector<4x32xf32> to vector<4xf32>
    %33 = vector.shape_cast %32 : vector<4xf32> to vector<4x1xf32>
    %34 = vector.shape_cast %29 : vector<4x1xf32> to vector<4x1xf32>
    %35 = vector.broadcast %34 : vector<4x1xf32> to vector<4x32xf32>
    %36 = vector.shape_cast %33 : vector<4x1xf32> to vector<4x1xf32>
    %37 = vector.broadcast %36 : vector<4x1xf32> to vector<4x32xf32>
    %38 = arith.select %25, %35, %37 : vector<4x32xi1>, vector<4x32xf32>
    %39 = arith.subf %22, %38 : vector<4x32xf32>
    %40 = math.exp %39 : vector<4x32xf32>
    %cst_21 = arith.constant 0.000000e+00 : f32
    %41 = vector.broadcast %cst_21 : f32 to vector<4x32xf32>
    %42 = arith.select %25, %40, %41 : vector<4x32xi1>, vector<4x32xf32>
    %cst_22 = arith.constant dense<0.000000e+00> : vector<4xf32>
    %43 = vector.multi_reduction <add>, %42, %cst_22 [1] : vector<4x32xf32> to vector<4xf32>
    %44 = vector.shape_cast %43 : vector<4xf32> to vector<4x1xf32>
    %cst_23 = arith.constant 0.000000e+00 : f32
    %45 = vector.broadcast %cst_23 : f32 to vector<4x32xf32>
    %46 = arith.select %25, %45, %40 : vector<4x32xi1>, vector<4x32xf32>
    %cst_24 = arith.constant dense<0.000000e+00> : vector<4xf32>
    %47 = vector.multi_reduction <add>, %46, %cst_24 [1] : vector<4x32xf32> to vector<4xf32>
    %48 = vector.shape_cast %47 : vector<4xf32> to vector<4x1xf32>
    %49 = vector.shape_cast %44 : vector<4x1xf32> to vector<4x1xf32>
    %50 = vector.broadcast %49 : vector<4x1xf32> to vector<4x32xf32>
    %51 = vector.shape_cast %48 : vector<4x1xf32> to vector<4x1xf32>
    %52 = vector.broadcast %51 : vector<4x1xf32> to vector<4x32xf32>
    %53 = arith.select %25, %50, %52 : vector<4x32xi1>, vector<4x32xf32>
    %54 = tpu.reciprocal %53 {approx = true} : vector<4x32xf32> -> vector<4x32xf32>
    %55 = arith.mulf %40, %54 : vector<4x32xf32>
    %c0_25 = arith.constant 0 : index
    %c0_26 = arith.constant 0 : index
    %56 = vector.load %arg8[%c0_25, %c0_26] : memref<4x32xf32, #tpu.memory_space<vmem>>, vector<4x32xf32>
    tpu.vector_store %arg8[%c0_25, %c0_26], %55 {strides = array<i32>} : memref<4x32xf32, #tpu.memory_space<vmem>>, vector<4x32xf32>,
    return
  }
  func.func @transform_0(%arg0: i32) -> (i32, i32) {
    %c0_i32 = arith.constant 0 : i32
    %c0_i32_0 = arith.constant 0 : i32
    return %arg0, %c0_i32 : i32, i32
  }
  func.func @transform_1(%arg0: i32) -> (i32, i32) {
    %c0_i32 = arith.constant 0 : i32
    %c0_i32_0 = arith.constant 0 : i32
    %c0_i32_1 = arith.constant 0 : i32
    return %c0_i32, %c0_i32_0 : i32, i32
  }
  func.func @transform_2(%arg0: i32) -> (i32, i32) {
    %c0_i32 = arith.constant 0 : i32
    %c0_i32_0 = arith.constant 0 : i32
    %c0_i32_1 = arith.constant 0 : i32
    return %c0_i32, %c0_i32_0 : i32, i32
  }
  func.func @transform_3(%arg0: i32) -> (i32, i32) {
    %c0_i32 = arith.constant 0 : i32
    %c0_i32_0 = arith.constant 0 : i32
    %c0_i32_1 = arith.constant 0 : i32
    return %c0_i32, %c0_i32_0 : i32, i32
  }
  func.func @transform_4(%arg0: i32) -> (i32, i32) {
    %c0_i32 = arith.constant 0 : i32
    %c0_i32_0 = arith.constant 0 : i32
    %c0_i32_1 = arith.constant 0 : i32
    return %c0_i32, %c0_i32_0 : i32, i32
  }
  func.func @transform_5(%arg0: i32) -> (i32, i32) {
    %c0_i32 = arith.constant 0 : i32
    %c0_i32_0 = arith.constant 0 : i32
    %c0_i32_1 = arith.constant 0 : i32
    return %c0_i32, %c0_i32_0 : i32, i32
  }
  func.func @transform_6(%arg0: i32) -> (i32, i32) {
    %c0_i32 = arith.constant 0 : i32
    %c0_i32_0 = arith.constant 0 : i32
    %c0_i32_1 = arith.constant 0 : i32
    return %c0_i32, %c0_i32_0 : i32, i32
  }
  func.func @transform_7(%arg0: i32) -> (i32, i32) {
    %c0_i32 = arith.constant 0 : i32
    %c0_i32_0 = arith.constant 0 : i32
    return %arg0, %c0_i32 : i32, i32
  }
}

</mosaic_0001>

<bundles_post_ra>
// kernel: ucf_image_predictor_forward.1
= control target key start
LH: loop header
LB: loop body
LE: loop exit
PB: predicated region body
PF: predicated region fallthrough
CT: control target
= control target key end

     0   :  { %vm65_vm0 = vcmask 523264   ;;  %vm219_vm1 = vcmask 785408   ;;  %v236_v32 = vlaneseq  ;;  %vm240_vm3 = vcmask 257024   ;;  %s487_s1 = inlined_call_operand.vmem [shape: bf16[64,128], index: 1, kind: input, shape index: {}]   ;;  %s488_s3 = inlined_call_operand.vmem [shape: bf16[128,96], index: 3, kind: input, shape index: {}]   ;;  %s489_s2 = inlined_call_operand.vmem [shape: f32[1,128], index: 2, kind: input, shape index: {}]   ;;  %s490_s0 = inlined_call_operand.vmem [shape: f32[4,64], index: 0, kind: input, shape index: {}]   ;;  %s491_s4 = inlined_call_operand.vmem [shape: f32[1,96], index: 4, kind: input, shape index: {}]   ;;  %s492_s5 = inlined_call_operand.vmem [shape: bf16[96,32], index: 5, kind: input, shape index: {}]   ;;  %s493_s6 = inlined_call_operand.vmem [shape: f32[1,32], index: 6, kind: input, shape index: {}]   ;;  %s494_s7 = inlined_call_operand.vmem [shape: f32[4,32], index: 7, kind: output, shape index: {}]  }
   0x1   :  { %v345_v0 = vld [vmem:[%s487_s1 + $0x18] sm:$0xff]  ;;  %v344_v2 = vld [vmem:[%s487_s1 + $0x10] sm:$0xff]  ;;  %v343_v4 = vld [vmem:[%s487_s1 + $0x8] sm:$0xff] }
   0x2   :  { %v353_v1 = vld [vmem:[%s488_s3 + $0x38] sm:$0xff]  ;;  %73 = vmatpush.bf16.msra.mxu0 %v345_v0  ;;  %v352_v3 = vld [vmem:[%s488_s3 + $0x30] sm:$0xff]  ;;  %v351_v5 = vld [vmem:[%s488_s3 + $0x28] sm:$0xff]  ;;  %v237_v33 = vand.u32 127, %v236_v32 }
   0x3   :  { %152 = vmatpush.bf16.msra.mxu1 %v353_v1  ;;  %v342_v6 = vld [vmem:[%s487_s1] sm:$0xff]  ;;  %v349_v10 = vld [vmem:[%s488_s3 + $0x18] sm:$0xff]  ;;  %v348_v11 = vld [vmem:[%s488_s3 + $0x10] sm:$0xff] }
   0x4   :  { %v27_v7 = vld [vmem:[%s490_s0] sm:$0xf]  ;;  %v347_v12 = vld [vmem:[%s488_s3 + $0x8] sm:$0xff]  ;;  %v357_v16 = vld [vmem:[%s492_s5 + $0x18] sm:$0xff]  ;;  %vm238_vm2 = vcmp.lt.s32.totalorder %v237_v33, 16 }
   0x5   :  { %v350_v8 = vld [vmem:[%s488_s3 + $0x20] sm:$0xff]  ;;  %v28_v9 = vpack.c.bf16 %v27_v7, %v27_v7  ;;  %v359_v14 = vld [vmem:[%s492_s5 + $0x28] sm:$0xff]  ;;  %v356_v17 = vld [vmem:[%s492_s5 + $0x10] sm:$0xff] }
   0x6   :  { %74 = vmatpush.bf16.msra.mxu0 %v344_v2  ;;  %v346_v13 = vld [vmem:[%s488_s3] sm:$0xff]  ;;  %225 = vmatpush.bf16.msra.mxu2 %v359_v14  ;;  %v355_v24 = vld [vmem:[%s492_s5 + $0x8] sm:$0xff] }
   0x7   :  { %153 = vmatpush.bf16.msra.mxu1 %v352_v3  ;;  %v358_v15 = vld [vmem:[%s492_s5 + $0x20] sm:$0xff] }
   0x8   :  { %v360_v18 = vld [vmem:[%s489_s2] ss:$0 sm:$0xff] }
   0x9   :  { %v354_v25 = vld [vmem:[%s492_s5] sm:$0xff] }
   0xa   :  { %75 = vmatpush.bf16.msra.mxu0 %v343_v4  ;;  %226 = vmatpush.bf16.msra.mxu2 %v358_v15  ;;  %v361_v26 = vld [vmem:[%s491_s4] ss:$0 sm:$0xff] }
   0xb   :  { %154 = vmatpush.bf16.msra.mxu1 %v351_v5  ;;  %v362_v34 = vld [vmem:[%s493_s6] ss:$0 sm:$0xff] }
   0xe   :  { %76 = vmatpush.bf16.msra.mxu0 %v342_v6  ;;  %227 = vmatpush.bf16.msra.mxu2 %v357_v16 }
   0xf   :  { %155 = vmatpush.bf16.msra.mxu1 %v350_v8 }
  0x11   :  { %284 = vmatmul.msk.bf16.vlgmr.msra.gmra.mxu0 %vm65_vm0, %v28_v9 }
  0x12   :  { %228 = vmatpush.bf16.msra.mxu2 %v356_v17 }
  0x13   :  { %156 = vmatpush.bf16.msra.mxu1 %v349_v10 }
  0x16   :  { %229 = vmatpush.bf16.msra.mxu2 %v355_v24 }
  0x17   :  { %157 = vmatpush.bf16.msra.mxu1 %v348_v11 }
  0x1a   :  { %230 = vmatpush.bf16.msra.mxu2 %v354_v25 }
  0x1b   :  { %158 = vmatpush.bf16.msra.mxu1 %v347_v12 }
  0x1f   :  { %159 = vmatpush.bf16.msra.mxu1 %v346_v13 }
  0x8e   :  { %v78_v19 = vpop.f32.mrf.mxu0 }
  0x8f   :  { %v79_v20 = vadd.f32 %v360_v18, %v78_v19 }
  0x91   :  { %v82_v21 = vmax.f32 %v79_v20, 0.0 }
  0x93   :  { %v83_v22 = vpack.c.bf16 %v82_v21, %v82_v21 }
  0x95   :  { %160 = vmatmul.bf16.vlgmr.msra.gmra.mxu1 %v83_v22 }
  0x96   :  { %v80_v23 = vpop.f32.mrf.mxu0 }
 0x112   :  { %v161_v27 = vpop.f32.mrf.mxu1 }
 0x113   :  { %v162_v28 = vadd.f32 %v361_v26, %v161_v27 }
 0x115   :  { %v165_v29 = vmax.f32 %v162_v28, 0.0 }
 0x117   :  { %v166_v30 = vpack.c.bf16 %v165_v29, %v165_v29 }
 0x119   :  { %341 = vmatmul.msk.bf16.vlgmr.msra.gmra.mxu2 %vm219_vm1, %v166_v30 }
 0x11a   :  { %v163_v31 = vpop.f32.mrf.mxu1 }
 0x19c   :  { %v232_v35 = vpop.f32.mrf.mxu2 }
 0x19d   :  { %v233_v36 = vadd.f32 %v362_v34, %v232_v35 }
 0x19f   :  { %v239_v37 = vsel %vm238_vm2, %v233_v36, -inf  ;;  %v244_v40 = vsel %vm238_vm2, -inf, %v233_v36 }
 0x1a0   :  { %v241_v38 = vsel %vm240_vm3, %v239_v37, -inf  ;;  %v245_v41 = vsel %vm240_vm3, %v244_v40, -inf }
 0x1a1   :  { %242 = vmax.xlane.f32.xlu0 %v241_v38 }
 0x1a4   :  { %v234_v39 = vpop.f32.mrf.mxu2 }
 0x1a9   :  { %246 = vmax.xlane.f32.xlu0 %v245_v41 }
 0x214   :  { %v243_v42 = vpop.xlane.xlu0 %242 }
 0x21c   :  { %v247_v43 = vpop.xlane.xlu0 %246 }
 0x21d   :  { %v248_v44 = vsel %vm238_vm2, %v243_v42, %v247_v43 }
 0x21e   :  { %v249_v45 = vsub.f32 %v233_v36, %v248_v44 }
 0x220   :  { %v250_v46 = vmul.f32 1.442695, %v249_v45 }
 0x222   :  { %363 = vpow2.f32 %v250_v46 }
 0x228   :  { %v364_v47 = vpop.eup %363 }
 0x229   :  { %v252_v48 = vsel %vm238_vm2, %v364_v47, 0.0  ;;  %v256_v50 = vsel %vm238_vm2, 0.0, %v364_v47 }
 0x22a   :  { %v253_v49 = vsel %vm240_vm3, %v252_v48, 0.0  ;;  %v257_v51 = vsel %vm240_vm3, %v256_v50, 0.0 }
 0x22b   :  { %254 = vadd.xlane.f32.xlu1 %v253_v49 }
 0x233   :  { %258 = vadd.xlane.f32.xlu1 %v257_v51 }
 0x29e   :  { %v255_v52 = vpop.xlane.xlu1 %254 }
 0x2a6   :  { %v259_v53 = vpop.xlane.xlu1 %258 }
 0x2a7   :  { %v260_v54 = vsel %vm238_vm2, %v255_v52, %v259_v53 }
 0x2a8   :  { %365 = vrcp.f32 %v260_v54 }
 0x2ae   :  { %v366_v55 = vpop.eup %365 }
 0x2af   :  { %v262_v56 = vmul.f32 %v366_v55, %v364_v47 }
 0x2b1   :  { %263 = vst.msk [vmem:[%s494_s7] sm:$0xf] %vm240_vm3, %v262_v56 }

</bundles_post_ra>
